<compile_context>
chip_gen: v7x
topology: tpu7x:2x2x1
jax: 0.10.0
libtpu: 0.0.40
codegen_flags: <defaults>
</compile_context>

<pallas_src>
import jax
import jax.numpy as jnp
from jax.experimental import pallas as pl
from jax.experimental.pallas import tpu as pltpu

_EPS = 1e-6            # nn.PairwiseDistance default eps
_LANE = 128
_SUBLANE = 8
_MAX_TD = 8192         # <= 64 lane-chunks per grid step keeps the unrolled body moderate


def _round_up(x: int, m: int) -> int:
    return ((x + m - 1) // m) * m


def _vmem_budget_bytes() -> int:
    """Scoped-VMEM budget per TPU generation.

    v5e/v6e have 128 MiB physical VMEM (scoped default 16/32 MiB is the limiter -> raise to
    64 MiB); v7x has 64 MiB per TensorCore -> keep the budget at 32 MiB.
    """
    try:
        cap = int(pltpu.get_tpu_info().vmem_capacity_bytes)
    except Exception:
        cap = 64 << 20          # conservative fallback (v7x-sized)
    return (64 << 20) if cap >= (96 << 20) else (32 << 20)


def _make_kernel(margin: float, td: int):
    n_chunks = td // _LANE

    def kernel(r0_ref, r1_ref, y_ref, out_ref, acc_ref):
        k = pl.program_id(1)

        @pl.when(k == 0)
        def _init():
            acc_ref[...] = jnp.zeros_like(acc_ref)

        # Walk the tile one 128-lane chunk at a time, slicing the refs directly so no
        # full-tile f32 temporaries (r0_f32 / r1_f32 / diff / sq) are ever materialized;
        # each chunk's values die at the accumulator store (bounded vreg live ranges).
        # Pure VPU work, trivially hidden under the HBM DMA of the next tile.
        for j in range(n_chunks):
            r0c = r0_ref[:, pl.ds(j * _LANE, _LANE)].astype(jnp.float32)
            r1c = r1_ref[:, pl.ds(j * _LANE, _LANE)].astype(jnp.float32)
            diff = r0c - r1c + _EPS
            acc_ref[...] += diff * diff

        @pl.when(k == pl.num_programs(1) - 1)
        def _finalize():
            ss = jnp.sum(acc_ref[...], axis=-1, keepdims=True)      # (tb, 1); one XLU reduce
            dist = jnp.sqrt(ss)
            y = y_ref[...]                                          # (tb, 1)
            hinge = jnp.maximum(0.0, margin - dist)
            out_ref[...] = y * dist + (1.0 - y) * hinge             # per-row loss

    return kernel


def ranking_loss(r0, r1, y, margin: float = 1.0):
    """Pallas TPU implementation of RankingLoss.forward.

    r0, r1 : arrays of shape (B, ...) (trailing dims flattened); DMA'd in native dtype,
             math in f32.
    y      : array of shape (B,) with labels in {0, 1}.
    returns: scalar f32 loss (mean over batch).
    """
    batch = r0.shape[0]
    r0f = r0.reshape(batch, -1)
    r1f = r1.reshape(batch, -1)
    d = r0f.shape[1]
    yf = jnp.asarray(y, jnp.float32).reshape(batch, 1)

    itemsize = jnp.dtype(r0f.dtype).itemsize

    # --- generation-aware tile selection -------------------------------------------------
    # Batch tile: native sublane packing for the input dtype (8 f32, 16 bf16/f16, 32 int8),
    # capped at 128 so batch > 128 always yields >=2 "parallel" blocks (v7x megacore).
    sub = max(_SUBLANE, 32 // max(1, itemsize))
    tb = min(128, _round_up(batch, sub))

    vmem_budget = _vmem_budget_bytes()
    input_budget = (vmem_budget * 3) // 4        # 2 inputs x 2 pipeline buffers
    per_tile_cap = 4 << 20                       # ~4 MiB of HBM DMA per input per grid step

    d_rounded = _round_up(d, _LANE)
    td = min(input_budget // (4 * tb * itemsize),
             per_tile_cap // (tb * itemsize),
             _MAX_TD,
             d_rounded)
    td = max(_LANE, (td // _LANE) * _LANE)

    b_pad = _round_up(batch, tb)
    d_pad = _round_up(d, td)

    # Pad r0 with 0 and r1 with +eps: padded D columns then give diff = 0 - eps + eps == 0
    # (exact in f32, negligible for 16-bit inputs), so no in-kernel column mask is needed.
    # Padded batch rows are sliced off before the mean, so their contents don't matter.
    if b_pad != batch or d_pad != d:
        r0f = jnp.pad(r0f, ((0, b_pad - batch), (0, d_pad - d)))
        r1f = jnp.pad(r1f, ((0, b_pad - batch), (0, d_pad - d)), constant_values=_EPS)
    if b_pad != batch:
        yf = jnp.pad(yf, ((0, b_pad - batch), (0, 0)))

    nb = b_pad // tb
    nd = d_pad // td

    cost = pl.CostEstimate(
        flops=4 * batch * d,                       # sub, eps add, square, accumulate
        transcendentals=batch,                     # one sqrt per row
        bytes_accessed=2 * batch * d * itemsize + 2 * batch * 4,
    )

    per_row = pl.pallas_call(
        _make_kernel(float(margin), td),
        out_shape=jax.ShapeDtypeStruct((b_pad, 1), jnp.float32),
        grid_spec=pltpu.PrefetchScalarGridSpec(
            num_scalar_prefetch=0,
            grid=(nb, nd),                         # reduction axis (D) last
            in_specs=[
                pl.BlockSpec((tb, td), lambda i, k: (i, k)),
                pl.BlockSpec((tb, td), lambda i, k: (i, k)),
                pl.BlockSpec((tb, 1), lambda i, k: (i, 0)),
            ],
            out_specs=pl.BlockSpec((tb, 1), lambda i, k: (i, 0)),
            scratch_shapes=[pltpu.VMEM((tb, _LANE), jnp.float32)],
        ),
        compiler_params=pltpu.CompilerParams(
            dimension_semantics=("parallel", "arbitrary"),
            vmem_limit_bytes=vmem_budget,
        ),
        cost_estimate=cost,
    )(r0f, r1f, yf)

    # Tiny batch-mean in the wrapper (keeps the batch grid axis megacore-parallel).
    return jnp.sum(per_row[:batch, 0]) / batch


def _reference(r0, r1, y, margin=1.0):
    # pure-JAX reference mirroring the PyTorch module (f32 math)
    b = r0.shape[0]
    r0f = jnp.asarray(r0, jnp.float32).reshape(b, -1)
    r1f = jnp.asarray(r1, jnp.float32).reshape(b, -1)
    diff = r0f - r1f + _EPS
    dist = jnp.sqrt(jnp.sum(diff * diff, axis=-1))
    yf = jnp.asarray(y, jnp.float32)
    loss = yf * dist + (1.0 - yf) * jnp.maximum(0.0, margin - dist)
    return jnp.mean(loss)


if __name__ == "__main__":
    key = jax.random.PRNGKey(0)
    k0, k1, k2, k3, k4, k5 = jax.random.split(key, 6)

    # --- Test 1: spec shapes (B, C, H, W) = (2, 4, 16, 16), f32 ---
    B, C, H, W = 2, 4, 16, 16
    r0 = jax.random.normal(k0, (B, C, H, W), dtype=jnp.float32)
    r1 = jax.random.normal(k1, (B, C, H, W), dtype=jnp.float32)
    y = jax.random.bernoulli(k2, 0.5, (B,)).astype(jnp.float32)

    loss = ranking_loss(r0, r1, y, margin=1.0)
    jax.block_until_ready(loss)
    ref = _reference(r0, r1, y, margin=1.0)
    assert jnp.allclose(loss, ref, rtol=1e-5, atol=1e-5), (loss, ref)

    # --- Test 2: ragged B and D (exercise padding: zeros for r0, +eps for r1), f32 ---
    B2, C2, H2, W2 = 5, 3, 10, 10
    s0 = jax.random.normal(k3, (B2, C2, H2, W2), dtype=jnp.float32)
    s1 = jax.random.normal(k4, (B2, C2, H2, W2), dtype=jnp.float32)
    y2 = jax.random.bernoulli(k5, 0.5, (B2,)).astype(jnp.float32)

    loss2 = ranking_loss(s0, s1, y2, margin=1.0)
    jax.block_until_ready(loss2)
    ref2 = _reference(s0, s1, y2, margin=1.0)
    assert jnp.allclose(loss2, ref2, rtol=1e-5, atol=1e-5), (loss2, ref2)

    # --- Test 3: native bf16 inputs (half the DMA traffic; f32 math in-kernel) ---
    r0b = r0.astype(jnp.bfloat16)
    r1b = r1.astype(jnp.bfloat16)
    loss3 = ranking_loss(r0b, r1b, y, margin=1.0)
    jax.block_until_ready(loss3)
    ref3 = _reference(r0b, r1b, y, margin=1.0)
    assert jnp.allclose(loss3, ref3, rtol=1e-3, atol=1e-3), (loss3, ref3)

    print("KERNEL_OK")
</pallas_src>

<mosaic_0001>
module attributes {stable_mosaic.version = 11 : i64} {
  func.func @kernel(%arg0: i32, %arg1: i32, %arg2: memref<8x1024xf32, #tpu.memory_space<vmem>>, %arg3: memref<8x1024xf32, #tpu.memory_space<vmem>>, %arg4: memref<8x1xf32, #tpu.memory_space<vmem>>, %arg5: memref<8x1xf32, #tpu.memory_space<vmem>>, %arg6: memref<8x128xf32, #tpu.memory_space<vmem>>) attributes {dimension_semantics = [#tpu.dimension_semantics<parallel>, #tpu.dimension_semantics<arbitrary>], iteration_bounds = array<i64: 1, 1>, scalar_prefetch = 0 : i64, scratch_operands = 1 : i64, tpu.core_type = #tpu.core_type<tc>, window_params = [{transform_indices = @transform_0, window_bounds = array<i64: 8, 1024>}, {transform_indices = @transform_1, window_bounds = array<i64: 8, 1024>}, {transform_indices = @transform_2, window_bounds = array<i64: 8, 1>}, {transform_indices = @transform_3, window_bounds = array<i64: 8, 1>}]} {
    %c0_i32 = arith.constant 0 : i32
    %0 = arith.cmpi eq, %arg1, %c0_i32 : i32
    %1 = arith.extui %0 : i1 to i32
    %c0_i32_0 = arith.constant 0 : i32
    %2 = arith.cmpi ne, %1, %c0_i32_0 : i32
    scf.if %2 {
      %cst_66 = arith.constant 0.000000e+00 : f32
      %78 = vector.broadcast %cst_66 : f32 to vector<8x128xf32>
      %c0_67 = arith.constant 0 : index
      %c0_68 = arith.constant 0 : index
      %79 = vector.load %arg6[%c0_67, %c0_68] : memref<8x128xf32, #tpu.memory_space<vmem>>, vector<8x128xf32>
      tpu.vector_store %arg6[%c0_67, %c0_68], %78 {strides = array<i32>} : memref<8x128xf32, #tpu.memory_space<vmem>>, vector<8x128xf32>,
    } else {
    }
    %c0 = arith.constant 0 : index
    %c0_1 = arith.constant 0 : index
    %3 = vector.load %arg2[%c0, %c0_1] : memref<8x1024xf32, #tpu.memory_space<vmem>>, vector<8x128xf32>
    %c0_2 = arith.constant 0 : index
    %c0_3 = arith.constant 0 : index
    %4 = vector.load %arg3[%c0_2, %c0_3] : memref<8x1024xf32, #tpu.memory_space<vmem>>, vector<8x128xf32>
    %5 = arith.subf %3, %4 : vector<8x128xf32>
    %cst = arith.constant 9.99999997E-7 : f32
    %6 = vector.broadcast %cst : f32 to vector<8x128xf32>
    %7 = arith.addf %5, %6 : vector<8x128xf32>
    %c0_4 = arith.constant 0 : index
    %c0_5 = arith.constant 0 : index
    %8 = vector.load %arg6[%c0_4, %c0_5] : memref<8x128xf32, #tpu.memory_space<vmem>>, vector<8x128xf32>
    %9 = arith.mulf %7, %7 : vector<8x128xf32>
    %10 = arith.addf %8, %9 : vector<8x128xf32>
    %c0_6 = arith.constant 0 : index
    %c0_7 = arith.constant 0 : index
    %11 = vector.load %arg6[%c0_6, %c0_7] : memref<8x128xf32, #tpu.memory_space<vmem>>, vector<8x128xf32>
    tpu.vector_store %arg6[%c0_6, %c0_7], %10 {strides = array<i32>} : memref<8x128xf32, #tpu.memory_space<vmem>>, vector<8x128xf32>,
    %c0_8 = arith.constant 0 : index
    %c128 = arith.constant 128 : index
    %12 = vector.load %arg2[%c0_8, %c128] : memref<8x1024xf32, #tpu.memory_space<vmem>>, vector<8x128xf32>
    %c0_9 = arith.constant 0 : index
    %c128_10 = arith.constant 128 : index
    %13 = vector.load %arg3[%c0_9, %c128_10] : memref<8x1024xf32, #tpu.memory_space<vmem>>, vector<8x128xf32>
    %14 = arith.subf %12, %13 : vector<8x128xf32>
    %cst_11 = arith.constant 9.99999997E-7 : f32
    %15 = vector.broadcast %cst_11 : f32 to vector<8x128xf32>
    %16 = arith.addf %14, %15 : vector<8x128xf32>
    %c0_12 = arith.constant 0 : index
    %c0_13 = arith.constant 0 : index
    %17 = vector.load %arg6[%c0_12, %c0_13] : memref<8x128xf32, #tpu.memory_space<vmem>>, vector<8x128xf32>
    %18 = arith.mulf %16, %16 : vector<8x128xf32>
    %19 = arith.addf %17, %18 : vector<8x128xf32>
    %c0_14 = arith.constant 0 : index
    %c0_15 = arith.constant 0 : index
    %20 = vector.load %arg6[%c0_14, %c0_15] : memref<8x128xf32, #tpu.memory_space<vmem>>, vector<8x128xf32>
    tpu.vector_store %arg6[%c0_14, %c0_15], %19 {strides = array<i32>} : memref<8x128xf32, #tpu.memory_space<vmem>>, vector<8x128xf32>,
    %c0_16 = arith.constant 0 : index
    %c256 = arith.constant 256 : index
    %21 = vector.load %arg2[%c0_16, %c256] : memref<8x1024xf32, #tpu.memory_space<vmem>>, vector<8x128xf32>
    %c0_17 = arith.constant 0 : index
    %c256_18 = arith.constant 256 : index
    %22 = vector.load %arg3[%c0_17, %c256_18] : memref<8x1024xf32, #tpu.memory_space<vmem>>, vector<8x128xf32>
    %23 = arith.subf %21, %22 : vector<8x128xf32>
    %cst_19 = arith.constant 9.99999997E-7 : f32
    %24 = vector.broadcast %cst_19 : f32 to vector<8x128xf32>
    %25 = arith.addf %23, %24 : vector<8x128xf32>
    %c0_20 = arith.constant 0 : index
    %c0_21 = arith.constant 0 : index
    %26 = vector.load %arg6[%c0_20, %c0_21] : memref<8x128xf32, #tpu.memory_space<vmem>>, vector<8x128xf32>
    %27 = arith.mulf %25, %25 : vector<8x128xf32>
    %28 = arith.addf %26, %27 : vector<8x128xf32>
    %c0_22 = arith.constant 0 : index
    %c0_23 = arith.constant 0 : index
    %29 = vector.load %arg6[%c0_22, %c0_23] : memref<8x128xf32, #tpu.memory_space<vmem>>, vector<8x128xf32>
    tpu.vector_store %arg6[%c0_22, %c0_23], %28 {strides = array<i32>} : memref<8x128xf32, #tpu.memory_space<vmem>>, vector<8x128xf32>,
    %c0_24 = arith.constant 0 : index
    %c384 = arith.constant 384 : index
    %30 = vector.load %arg2[%c0_24, %c384] : memref<8x1024xf32, #tpu.memory_space<vmem>>, vector<8x128xf32>
    %c0_25 = arith.constant 0 : index
    %c384_26 = arith.constant 384 : index
    %31 = vector.load %arg3[%c0_25, %c384_26] : memref<8x1024xf32, #tpu.memory_space<vmem>>, vector<8x128xf32>
    %32 = arith.subf %30, %31 : vector<8x128xf32>
    %cst_27 = arith.constant 9.99999997E-7 : f32
    %33 = vector.broadcast %cst_27 : f32 to vector<8x128xf32>
    %34 = arith.addf %32, %33 : vector<8x128xf32>
    %c0_28 = arith.constant 0 : index
    %c0_29 = arith.constant 0 : index
    %35 = vector.load %arg6[%c0_28, %c0_29] : memref<8x128xf32, #tpu.memory_space<vmem>>, vector<8x128xf32>
    %36 = arith.mulf %34, %34 : vector<8x128xf32>
    %37 = arith.addf %35, %36 : vector<8x128xf32>
    %c0_30 = arith.constant 0 : index
    %c0_31 = arith.constant 0 : index
    %38 = vector.load %arg6[%c0_30, %c0_31] : memref<8x128xf32, #tpu.memory_space<vmem>>, vector<8x128xf32>
    tpu.vector_store %arg6[%c0_30, %c0_31], %37 {strides = array<i32>} : memref<8x128xf32, #tpu.memory_space<vmem>>, vector<8x128xf32>,
    %c0_32 = arith.constant 0 : index
    %c512 = arith.constant 512 : index
    %39 = vector.load %arg2[%c0_32, %c512] : memref<8x1024xf32, #tpu.memory_space<vmem>>, vector<8x128xf32>
    %c0_33 = arith.constant 0 : index
    %c512_34 = arith.constant 512 : index
    %40 = vector.load %arg3[%c0_33, %c512_34] : memref<8x1024xf32, #tpu.memory_space<vmem>>, vector<8x128xf32>
    %41 = arith.subf %39, %40 : vector<8x128xf32>
    %cst_35 = arith.constant 9.99999997E-7 : f32
    %42 = vector.broadcast %cst_35 : f32 to vector<8x128xf32>
    %43 = arith.addf %41, %42 : vector<8x128xf32>
    %c0_36 = arith.constant 0 : index
    %c0_37 = arith.constant 0 : index
    %44 = vector.load %arg6[%c0_36, %c0_37] : memref<8x128xf32, #tpu.memory_space<vmem>>, vector<8x128xf32>
    %45 = arith.mulf %43, %43 : vector<8x128xf32>
    %46 = arith.addf %44, %45 : vector<8x128xf32>
    %c0_38 = arith.constant 0 : index
    %c0_39 = arith.constant 0 : index
    %47 = vector.load %arg6[%c0_38, %c0_39] : memref<8x128xf32, #tpu.memory_space<vmem>>, vector<8x128xf32>
    tpu.vector_store %arg6[%c0_38, %c0_39], %46 {strides = array<i32>} : memref<8x128xf32, #tpu.memory_space<vmem>>, vector<8x128xf32>,
    %c0_40 = arith.constant 0 : index
    %c640 = arith.constant 640 : index
    %48 = vector.load %arg2[%c0_40, %c640] : memref<8x1024xf32, #tpu.memory_space<vmem>>, vector<8x128xf32>
    %c0_41 = arith.constant 0 : index
    %c640_42 = arith.constant 640 : index
    %49 = vector.load %arg3[%c0_41, %c640_42] : memref<8x1024xf32, #tpu.memory_space<vmem>>, vector<8x128xf32>
    %50 = arith.subf %48, %49 : vector<8x128xf32>
    %cst_43 = arith.constant 9.99999997E-7 : f32
    %51 = vector.broadcast %cst_43 : f32 to vector<8x128xf32>
    %52 = arith.addf %50, %51 : vector<8x128xf32>
    %c0_44 = arith.constant 0 : index
    %c0_45 = arith.constant 0 : index
    %53 = vector.load %arg6[%c0_44, %c0_45] : memref<8x128xf32, #tpu.memory_space<vmem>>, vector<8x128xf32>
    %54 = arith.mulf %52, %52 : vector<8x128xf32>
    %55 = arith.addf %53, %54 : vector<8x128xf32>
    %c0_46 = arith.constant 0 : index
    %c0_47 = arith.constant 0 : index
    %56 = vector.load %arg6[%c0_46, %c0_47] : memref<8x128xf32, #tpu.memory_space<vmem>>, vector<8x128xf32>
    tpu.vector_store %arg6[%c0_46, %c0_47], %55 {strides = array<i32>} : memref<8x128xf32, #tpu.memory_space<vmem>>, vector<8x128xf32>,
    %c0_48 = arith.constant 0 : index
    %c768 = arith.constant 768 : index
    %57 = vector.load %arg2[%c0_48, %c768] : memref<8x1024xf32, #tpu.memory_space<vmem>>, vector<8x128xf32>
    %c0_49 = arith.constant 0 : index
    %c768_50 = arith.constant 768 : index
    %58 = vector.load %arg3[%c0_49, %c768_50] : memref<8x1024xf32, #tpu.memory_space<vmem>>, vector<8x128xf32>
    %59 = arith.subf %57, %58 : vector<8x128xf32>
    %cst_51 = arith.constant 9.99999997E-7 : f32
    %60 = vector.broadcast %cst_51 : f32 to vector<8x128xf32>
    %61 = arith.addf %59, %60 : vector<8x128xf32>
    %c0_52 = arith.constant 0 : index
    %c0_53 = arith.constant 0 : index
    %62 = vector.load %arg6[%c0_52, %c0_53] : memref<8x128xf32, #tpu.memory_space<vmem>>, vector<8x128xf32>
    %63 = arith.mulf %61, %61 : vector<8x128xf32>
    %64 = arith.addf %62, %63 : vector<8x128xf32>
    %c0_54 = arith.constant 0 : index
    %c0_55 = arith.constant 0 : index
    %65 = vector.load %arg6[%c0_54, %c0_55] : memref<8x128xf32, #tpu.memory_space<vmem>>, vector<8x128xf32>
    tpu.vector_store %arg6[%c0_54, %c0_55], %64 {strides = array<i32>} : memref<8x128xf32, #tpu.memory_space<vmem>>, vector<8x128xf32>,
    %c0_56 = arith.constant 0 : index
    %c896 = arith.constant 896 : index
    %66 = vector.load %arg2[%c0_56, %c896] : memref<8x1024xf32, #tpu.memory_space<vmem>>, vector<8x128xf32>
    %c0_57 = arith.constant 0 : index
    %c896_58 = arith.constant 896 : index
    %67 = vector.load %arg3[%c0_57, %c896_58] : memref<8x1024xf32, #tpu.memory_space<vmem>>, vector<8x128xf32>
    %68 = arith.subf %66, %67 : vector<8x128xf32>
    %cst_59 = arith.constant 9.99999997E-7 : f32
    %69 = vector.broadcast %cst_59 : f32 to vector<8x128xf32>
    %70 = arith.addf %68, %69 : vector<8x128xf32>
    %c0_60 = arith.constant 0 : index
    %c0_61 = arith.constant 0 : index
    %71 = vector.load %arg6[%c0_60, %c0_61] : memref<8x128xf32, #tpu.memory_space<vmem>>, vector<8x128xf32>
    %72 = arith.mulf %70, %70 : vector<8x128xf32>
    %73 = arith.addf %71, %72 : vector<8x128xf32>
    %c0_62 = arith.constant 0 : index
    %c0_63 = arith.constant 0 : index
    %74 = vector.load %arg6[%c0_62, %c0_63] : memref<8x128xf32, #tpu.memory_space<vmem>>, vector<8x128xf32>
    tpu.vector_store %arg6[%c0_62, %c0_63], %73 {strides = array<i32>} : memref<8x128xf32, #tpu.memory_space<vmem>>, vector<8x128xf32>,
    %c0_i32_64 = arith.constant 0 : i32
    %75 = arith.cmpi eq, %arg1, %c0_i32_64 : i32
    %76 = arith.extui %75 : i1 to i32
    %c0_i32_65 = arith.constant 0 : i32
    %77 = arith.cmpi ne, %76, %c0_i32_65 : i32
    scf.if %77 {
      %c0_66 = arith.constant 0 : index
      %c0_67 = arith.constant 0 : index
      %78 = vector.load %arg6[%c0_66, %c0_67] : memref<8x128xf32, #tpu.memory_space<vmem>>, vector<8x128xf32>
      %cst_68 = arith.constant dense<0.000000e+00> : vector<8xf32>
      %79 = vector.multi_reduction <add>, %78, %cst_68 [1] : vector<8x128xf32> to vector<8xf32>
      %80 = vector.shape_cast %79 : vector<8xf32> to vector<8x1xf32>
      %81 = math.sqrt %80 : vector<8x1xf32>
      %c0_69 = arith.constant 0 : index
      %c0_70 = arith.constant 0 : index
      %82 = vector.load %arg4[%c0_69, %c0_70] : memref<8x1xf32, #tpu.memory_space<vmem>>, vector<8x1xf32>
      %cst_71 = arith.constant 1.000000e+00 : f32
      %83 = vector.broadcast %cst_71 : f32 to vector<8x1xf32>
      %84 = arith.subf %83, %81 : vector<8x1xf32>
      %cst_72 = arith.constant 0.000000e+00 : f32
      %85 = vector.broadcast %cst_72 : f32 to vector<8x1xf32>
      %86 = arith.maximumf %85, %84 : vector<8x1xf32>
      %87 = arith.mulf %82, %81 : vector<8x1xf32>
      %cst_73 = arith.constant 1.000000e+00 : f32
      %88 = vector.broadcast %cst_73 : f32 to vector<8x1xf32>
      %89 = arith.subf %88, %82 : vector<8x1xf32>
      %90 = arith.mulf %89, %86 : vector<8x1xf32>
      %91 = arith.addf %87, %90 : vector<8x1xf32>
      %c0_74 = arith.constant 0 : index
      %c0_75 = arith.constant 0 : index
      %92 = vector.load %arg5[%c0_74, %c0_75] : memref<8x1xf32, #tpu.memory_space<vmem>>, vector<8x1xf32>
      tpu.vector_store %arg5[%c0_74, %c0_75], %91 {strides = array<i32>} : memref<8x1xf32, #tpu.memory_space<vmem>>, vector<8x1xf32>,
    } else {
    }
    return
  }
  func.func @transform_0(%arg0: i32, %arg1: i32) -> (i32, i32) {
    %c0_i32 = arith.constant 0 : i32
    return %arg0, %arg1 : i32, i32
  }
  func.func @transform_1(%arg0: i32, %arg1: i32) -> (i32, i32) {
    %c0_i32 = arith.constant 0 : i32
    return %arg0, %arg1 : i32, i32
  }
  func.func @transform_2(%arg0: i32, %arg1: i32) -> (i32, i32) {
    %c0_i32 = arith.constant 0 : i32
    %c0_i32_0 = arith.constant 0 : i32
    return %arg0, %c0_i32 : i32, i32
  }
  func.func @transform_3(%arg0: i32, %arg1: i32) -> (i32, i32) {
    %c0_i32 = arith.constant 0 : i32
    %c0_i32_0 = arith.constant 0 : i32
    return %arg0, %c0_i32 : i32, i32
  }
}

</mosaic_0001>

<bundles_post_ra>
// kernel: tpu_custom_call.1
= control target key start
LH: loop header
LB: loop body
LE: loop exit
PB: predicated region body
PF: predicated region fallthrough
CT: control target
= control target key end

     0   :  { %8 = vsyncpa [#allocation4], 0  ;;  %s239_s0 = inlined_call_operand.hbm [shape: f32[8,1024], index: 0, kind: input, shape index: {}]   ;;  %s240_s1 = inlined_call_operand.hbm [shape: f32[8,1024], index: 1, kind: input, shape index: {}]   ;;  %s241_s2 = inlined_call_operand.vmem [shape: f32[8,1], index: 2, kind: input, shape index: {}]   ;;  %s242_s3 = inlined_call_operand.vmem [shape: f32[8,1], index: 3, kind: output, shape index: {}]  }
   0x1   :  { %9 = vsyncpa [#allocation6], 0  ;;  %s187_s12 = smov [#allocation3]   ;;  %s188_s14 = smov [#allocation5]  }
   0x2   :  { %s16_s13 = sshll.u32 %s187_s12, 4  ;;  %s26_s15 = sshll.u32 %s188_s14, 4  ;;  %s17_s13 = int_to_ptr.vmem [resolvable:$true] %s16_s13  ;;  %s27_s15 = int_to_ptr.vmem [resolvable:$true] %s26_s15 }
   0x3   :  { %s139_s18 = scalar_lea.hbm %s239_s0, 1024 }
   0x4   :  { %p140_p0 = scmp.ne.s32.totalorder %s239_s0, %s139_s18  ;;  %p143_p1 = scmp.lt.u32.totalorder %s139_s18, %s239_s0 }
   0x6   :  { %p145_p2 = pnand %p143_p1, %p140_p0 }
   0x8   :  { %148 = shalt.err (!%p145_p2)
}
   0x9   :  { %s149_s23 = scalar_lea.vmem %s17_s13, 1024  ;;  %p154_p4 = scmp.lt.s32.totalorder %s17_s13, %s17_s13 }
   0xa   :  { %p150_p3 = scmp.ne.s32.totalorder %s17_s13, %s149_s23  ;;  %p155_p5 = scmp.lt.s32.totalorder %s149_s23, %s149_s23 }
   0xc   :  { %p156_p6 = por %p155_p5, %p154_p4 }
   0xe   :  { %p157_p7 = pnand %p156_p6, %p150_p3 }
  0x10   :  { %160 = shalt.err (!%p157_p7)
}
  0x11   :  { %19 = dma.hbm_to_vmem [thread:$0]  %s239_s0, 1024, %s17_s13, [#allocation4]  }
  0x12   :  { %s161_s28 = scalar_lea.hbm %s240_s1, 1024 }
  0x13   :  { %p162_p8 = scmp.ne.s32.totalorder %s240_s1, %s161_s28  ;;  %p165_p9 = scmp.lt.u32.totalorder %s161_s28, %s240_s1 }
  0x15   :  { %p167_p10 = pnand %p165_p9, %p162_p8 }
  0x17   :  { %170 = shalt.err (!%p167_p10)
}
  0x18   :  { %s171_s6 = scalar_lea.vmem %s27_s15, 1024  ;;  %p176_p12 = scmp.lt.s32.totalorder %s27_s15, %s27_s15 }
  0x19   :  { %p172_p11 = scmp.ne.s32.totalorder %s27_s15, %s171_s6  ;;  %p177_p13 = scmp.lt.s32.totalorder %s171_s6, %s171_s6 }
  0x1b   :  { %p178_p0 = por %p177_p13, %p176_p12 }
  0x1d   :  { %p179_p1 = pnand %p178_p0, %p172_p11 }
  0x1f   :  { %182 = shalt.err (!%p179_p1)
}
  0x20   :  { %29 = dma.hbm_to_vmem [thread:$0]  %s240_s1, 1024, %s27_s15, [#allocation6]  }
  0x21   :  { %183 = dma.done.wait [#allocation4], 1024  }
  0x22   :  { %184 = vsyncadd [#allocation4], 4294966272 }
  0x23   :  { %185 = dma.done.wait [#allocation6], 1024  }
  0x24   :  { %186 = vsyncadd [#allocation6], 4294966272  ;;  %v43_v0 = vld [vmem:[#allocation3] sm:$0xff]  ;;  %v51_v2 = vld [vmem:[#allocation3 + $0x8] sm:$0xff]  ;;  %vm127_vm2 = vcmask 7168  }
  0x25   :  { %v44_v1 = vld [vmem:[#allocation5] sm:$0xff]  ;;  %v52_v4 = vld [vmem:[#allocation5 + $0x8] sm:$0xff]  ;;  %v59_v5 = vld [vmem:[#allocation3 + $0x10] sm:$0xff] }
  0x26   :  { %v45_v3 = vsub.f32 %v43_v0, %v44_v1  ;;  %v60_v6 = vld [vmem:[#allocation5 + $0x10] sm:$0xff]  ;;  %v53_v7 = vsub.f32 %v51_v2, %v52_v4  ;;  %v67_v9 = vld [vmem:[#allocation3 + $0x18] sm:$0xff]  ;;  %v75_v11 = vld [vmem:[#allocation3 + $0x20] sm:$0xff] }
  0x27   :  { %v61_v8 = vsub.f32 %v59_v5, %v60_v6  ;;  %v68_v10 = vld [vmem:[#allocation5 + $0x18] sm:$0xff]  ;;  %v76_v14 = vld [vmem:[#allocation5 + $0x20] sm:$0xff]  ;;  %v83_v15 = vld [vmem:[#allocation3 + $0x28] sm:$0xff] }
  0x28   :  { %v46_v12 = vadd.f32 1e-06, %v45_v3  ;;  %v69_v13 = vsub.f32 %v67_v9, %v68_v10  ;;  %v84_v16 = vld [vmem:[#allocation5 + $0x28] sm:$0xff]  ;;  %v54_v17 = vadd.f32 1e-06, %v53_v7  ;;  %v77_v19 = vsub.f32 %v75_v11, %v76_v14  ;;  %v91_v21 = vld [vmem:[#allocation3 + $0x30] sm:$0xff] }
  0x29   :  { %v62_v18 = vadd.f32 1e-06, %v61_v8  ;;  %v85_v20 = vsub.f32 %v83_v15, %v84_v16  ;;  %v92_v22 = vld [vmem:[#allocation5 + $0x30] sm:$0xff]  ;;  %v99_v25 = vld [vmem:[#allocation3 + $0x38] sm:$0xff]  ;;  %v120_v53 = vld [vmem:[%s241_s2] sm:$0xff] }
  0x2a   :  { %v48_v23 = vmul.f32 %v46_v12, %v46_v12  ;;  %v70_v24 = vadd.f32 1e-06, %v69_v13  ;;  %v100_v26 = vld [vmem:[#allocation5 + $0x38] sm:$0xff]  ;;  %v56_v27 = vmul.f32 %v54_v17, %v54_v17  ;;  %v78_v29 = vadd.f32 1e-06, %v77_v19 }
  0x2b   :  { %v64_v28 = vmul.f32 %v62_v18, %v62_v18  ;;  %v93_v30 = vsub.f32 %v91_v21, %v92_v22  ;;  %v86_v33 = vadd.f32 1e-06, %v85_v20  ;;  %v101_v34 = vsub.f32 %v99_v25, %v100_v26 }
  0x2c   :  { %v57_v31 = vadd.f32 %v56_v27, %v48_v23  ;;  %v72_v32 = vmul.f32 %v70_v24, %v70_v24  ;;  %v80_v36 = vmul.f32 %v78_v29, %v78_v29  ;;  %v124_v55 = vsub.f32 1.0, %v120_v53 }
  0x2d   :  { %v94_v37 = vadd.f32 1e-06, %v93_v30  ;;  %v88_v39 = vmul.f32 %v86_v33, %v86_v33  ;;  %v102_v40 = vadd.f32 1e-06, %v101_v34 }
  0x2e   :  { %v65_v35 = vadd.f32 %v64_v28, %v57_v31 }
  0x2f   :  { %v96_v42 = vmul.f32 %v94_v37, %v94_v37  ;;  %v104_v44 = vmul.f32 %v102_v40, %v102_v40 }
  0x30   :  { %v73_v38 = vadd.f32 %v72_v32, %v65_v35 }
  0x32   :  { %v81_v41 = vadd.f32 %v80_v36, %v73_v38 }
  0x34   :  { %v89_v43 = vadd.f32 %v88_v39, %v81_v41 }
  0x36   :  { %v97_v45 = vadd.f32 %v96_v42, %v89_v43 }
  0x38   :  { %v105_v46 = vadd.f32 %v104_v44, %v97_v45 }
  0x3a   :  { %111 = vadd.xlane.f32.xlu0 %v105_v46 }
  0xc7   :  { %v112_v47 = vpop.xlane.xlu0 %111 }
  0xc8   :  { %137 = vrsqrt.f32 %v112_v47  ;;  %vm115_vm0 = vcmp.eq.f32.partialorder %v112_v47, inf  ;;  %v118_v50 = vand.u32 2147483648, %v112_v47  ;;  %vm117_vm1 = vcmp.eq.f32.partialorder %v112_v47, 0.0 }
  0xd2   :  { %v138_v48 = vpop.eup %137 }
  0xd3   :  { %v114_v49 = vmul.f32 %v138_v48, %v112_v47 }
  0xd5   :  { %v116_v51 = vsel %vm115_vm0, %v112_v47, %v114_v49 }
  0xd6   :  { %v119_v52 = vsel %vm117_vm1, %v118_v50, %v116_v51 }
  0xd7   :  { %v121_v54 = vsub.f32 1.0, %v119_v52  ;;  %v123_v57 = vmul.f32 %v120_v53, %v119_v52 }
  0xd9   :  { %v122_v56 = vmax.f32 %v121_v54, 0.0 }
  0xdb   :  { %v125_v58 = vmul.f32 %v124_v55, %v122_v56 }
  0xdd   :  { %v126_v59 = vadd.f32 %v125_v58, %v123_v57 }
  0xdf   :  { %128 = vst.msk [vmem:[%s242_s3] sm:$0xff] %vm127_vm2, %v126_v59 }
  0xe0   :  { %133 = vsyncpa [#allocation4], 1 }
  0xe1   :  { %134 = vsyncpa [#allocation6], 1 }

</bundles_post_ra>
